<compile_context>
chip_gen: v7x
topology: tpu7x:2x2x1
jax: 0.10.0
libtpu: 0.0.40
codegen_flags: <defaults>
</compile_context>

<pallas_src>
import jax
import jax.numpy as jnp
from jax import lax
from jax.experimental import pallas as pl
from jax.experimental.pallas import tpu as pltpu


def _dfr_seq_kernel(x_ref, mask_ref, prev_ref, out_ref, carry_ref, vecx_ref):
    """One grid step = one (hidden-tile, time-block) pair.

    x_ref:    (T_pad, B, 1)  whole (padded) input sequence, VMEM-resident
    mask_ref: (B, TH)        mask pre-broadcast over batch, VMEM-resident
    prev_ref: (B, TH)        initial recurrent state for this hidden tile
    out_ref:  (TT, B, TH)    outputs for this (time-block, hidden-tile)
    carry_ref:(B, TH)        scratch carrying the state between time blocks
    vecx_ref: (TT, B, TH)    scratch holding the hoisted non-recurrent product
    """
    tt = out_ref.shape[0]
    tb = pl.program_id(1)

    # NOTE: correctness of the recurrence requires the time axis (grid axis 1)
    # to stay the innermost, sequentially executed ("arbitrary") grid axis.
    # Do not reorder the grid axes or mark the time axis "parallel".
    @pl.when(tb == 0)
    def _():
        carry_ref[...] = prev_ref[...]

    # Non-recurrent work, hoisted off the serial chain: the K=1 contraction
    # x_t @ mask is just a broadcast multiply, computed for all TT steps.
    t0 = pl.multiple_of(tb * tt, tt)
    vecx_ref[...] = x_ref[pl.ds(t0, tt)] * mask_ref[...]      # (TT, B, TH)

    def step(i, carry):
        out = jnp.tanh(vecx_ref[i] + 0.8 * carry)
        out_ref[i] = out.astype(out_ref.dtype)
        return out

    # Carry stays in vregs across the unrolled time loop; the carry scratch is
    # written exactly once per grid step.
    carry_ref[...] = lax.fori_loop(0, tt, step, carry_ref[...], unroll=True)


def _pad_axis(a, axis, target):
    pad = target - a.shape[axis]
    if pad == 0:
        return a
    cfg = [(0, 0)] * a.ndim
    cfg[axis] = (0, pad)
    return jnp.pad(a, cfg)


def _choose_tiles(T, B, H_pad, vmem_budget_bytes=12 << 20):
    """Pick (TT, TH): time-block length and hidden-tile width."""
    f32 = 4
    m = H_pad // 128
    # Largest multiple-of-128 divisor of H_pad, capped at 1024 lanes (keeps
    # the vreg-resident carry small while still amortizing per-step overhead).
    th_units = 1
    for d in range(1, m + 1):
        if m % d == 0 and 128 * d <= 1024:
            th_units = d
    TH = 128 * th_units
    # v7x megacore: keep the "parallel" hidden axis at extent >= 2 when
    # possible so both TensorCores get work (harmless on single-TC v5e/v6e).
    if H_pad // TH == 1 and m >= 2 and m % 2 == 0:
        TH = H_pad // 2

    # Time block: 16-64 steps amortize the fixed per-grid-step overhead.
    TT = max(1, min(32, T))

    def footprint(tt):
        t_pad = pl.cdiv(T, tt) * tt
        out_dbuf = 2 * tt * B * TH * f32      # double-buffered output block
        vecx = tt * B * TH * f32              # hoisted non-recurrent product
        x_res = 2 * t_pad * B * f32           # resident input sequence
        state = 6 * B * TH * f32              # mask/prev (dbuf) + carry
        return out_dbuf + vecx + x_res + state

    while TT > 4 and footprint(TT) > vmem_budget_bytes:
        TT //= 2
    return TT, TH


def dfr_cell_sequence(x_seq, mask, prev_output, out_dtype=jnp.float32):
    """Run DFRCell.forward over a whole sequence with one pallas_call.

    x_seq:       [T, B, 1]
    mask:        [1, H]
    prev_output: [B, H]   (state before the first step)
    returns:     [T, B, H] outputs of every step (dtype out_dtype; use
                 jnp.bfloat16 on v6e/v7x to halve HBM write traffic).
    """
    T, B, n_in = x_seq.shape
    assert n_in == 1 and mask.shape[0] == 1, "DFRCell: mask is [1, n_hidden]"
    H = mask.shape[1]
    assert prev_output.shape == (B, H)

    # Lane-dense output: pad the hidden dim up to a multiple of 128.
    # Zero padding is exact through the recurrence: tanh(0 + 0.8*0) == 0.
    H_pad = max(128, pl.cdiv(H, 128) * 128)
    TT, TH = _choose_tiles(T, B, H_pad)
    n_h = H_pad // TH
    T_pad = pl.cdiv(T, TT) * TT
    n_tt = T_pad // TT

    mask_b = jnp.broadcast_to(
        _pad_axis(mask.astype(jnp.float32), 1, H_pad), (B, H_pad))
    prev_p = _pad_axis(prev_output.astype(jnp.float32), 1, H_pad)
    # TODO(synk): for extremely long sequences, stream x in (TT, B, 1) blocks
    # instead of keeping the whole padded sequence VMEM-resident.
    x_p = _pad_axis(x_seq.astype(jnp.float32), 0, T_pad)

    out = pl.pallas_call(
        _dfr_seq_kernel,
        out_shape=jax.ShapeDtypeStruct((T_pad, B, H_pad), out_dtype),
        grid=(n_h, n_tt),
        in_specs=[
            # Whole (padded) input sequence stays resident in VMEM: one DMA
            # instead of n_h * T tiny per-step DMAs.
            pl.BlockSpec((T_pad, B, 1), lambda h, tb: (0, 0, 0)),
            # Mask tile (pre-broadcast over batch): resident across time.
            pl.BlockSpec((B, TH), lambda h, tb: (0, h)),
            # Initial state tile: only read at tb == 0.
            pl.BlockSpec((B, TH), lambda h, tb: (0, h)),
        ],
        out_specs=pl.BlockSpec((TT, B, TH), lambda h, tb: (tb, 0, h)),
        scratch_shapes=[
            pltpu.VMEM((B, TH), jnp.float32),        # recurrence carry
            pltpu.VMEM((TT, B, TH), jnp.float32),    # hoisted vec_x block
        ],
        compiler_params=pltpu.CompilerParams(
            # Time must remain the innermost, sequential ("arbitrary") axis.
            dimension_semantics=("parallel", "arbitrary")),
    )(x_p, mask_b, prev_p)

    return out[:T, :, :H]


def dfr_cell(x, mask, prev_output):
    """Single-step forward matching DFRCell.forward(x, prev_output).

    Note: for a single trivial step the pallas_call launch cost dominates;
    the pure-JAX dfr_cell_ref below is competitive if only one step is needed.
    """
    return dfr_cell_sequence(x[None], mask, prev_output)[0]


# ----------------------------- pure-JAX reference ---------------------------

def dfr_cell_ref(x, mask, prev_output):
    return jnp.tanh(x @ mask + 0.8 * prev_output)


def dfr_sequence_ref(x_seq, mask, prev_output):
    def step(prev, x_t):
        out = dfr_cell_ref(x_t, mask, prev)
        return out, out
    _, outs = jax.lax.scan(step, prev_output, x_seq)
    return outs


if __name__ == "__main__":
    # Small shapes consistent with the module: n_hidden reservoir nodes,
    # scalar input per step (mask is [1, n_hidden]), batch of sequences.
    T, B, H = 16, 8, 32

    key = jax.random.PRNGKey(0)
    k_x, k_mask, k_prev = jax.random.split(key, 3)

    x_seq = jax.random.normal(k_x, (T, B, 1), dtype=jnp.float32)
    # nn.init.uniform_(self.mask, a=0.0, b=1.0)
    mask = jax.random.uniform(k_mask, (1, H), dtype=jnp.float32,
                              minval=0.0, maxval=1.0)
    prev0 = jax.random.normal(k_prev, (B, H), dtype=jnp.float32)

    # Fused whole-sequence kernel.
    out_seq = dfr_cell_sequence(x_seq, mask, prev0)
    out_seq = jax.block_until_ready(out_seq)
    ref_seq = dfr_sequence_ref(x_seq, mask, prev0)
    assert out_seq.shape == (T, B, H)
    assert jnp.allclose(out_seq, ref_seq, atol=1e-4, rtol=1e-4), \
        "sequence mismatch vs JAX ref"

    # Single-step path (the literal module forward).
    out1 = dfr_cell(x_seq[0], mask, prev0)
    out1 = jax.block_until_ready(out1)
    ref1 = dfr_cell_ref(x_seq[0], mask, prev0)
    assert jnp.allclose(out1, ref1, atol=1e-4, rtol=1e-4), \
        "single-step mismatch vs JAX ref"

    print("KERNEL_OK")
</pallas_src>

<mosaic_0001>
module attributes {stable_mosaic.version = 11 : i64} {
  func.func @_dfr_seq_kernel(%arg0: i32, %arg1: i32, %arg2: memref<16x8x1xf32, #tpu.memory_space<vmem>>, %arg3: memref<8x128xf32, #tpu.memory_space<vmem>>, %arg4: memref<8x128xf32, #tpu.memory_space<vmem>>, %arg5: memref<16x8x128xf32, #tpu.memory_space<vmem>>, %arg6: memref<8x128xf32, #tpu.memory_space<vmem>>, %arg7: memref<16x8x128xf32, #tpu.memory_space<vmem>>) attributes {dimension_semantics = [#tpu.dimension_semantics<parallel>, #tpu.dimension_semantics<arbitrary>], iteration_bounds = array<i64: 1, 1>, scalar_prefetch = 0 : i64, scratch_operands = 2 : i64, tpu.core_type = #tpu.core_type<tc>, window_params = [{pipeline_mode = #tpu.pipeline_mode<synchronous>, transform_indices = @transform_0, window_bounds = array<i64: 16, 8, 1>}, {transform_indices = @transform_1, window_bounds = array<i64: 8, 128>}, {transform_indices = @transform_2, window_bounds = array<i64: 8, 128>}, {transform_indices = @transform_3, window_bounds = array<i64: 16, 8, 128>}]} {
    %c0_i32 = arith.constant 0 : i32
    %0 = arith.cmpi eq, %arg1, %c0_i32 : i32
    %1 = arith.extui %0 : i1 to i32
    %c0_i32_0 = arith.constant 0 : i32
    %2 = arith.cmpi ne, %1, %c0_i32_0 : i32
    scf.if %2 {
      %c0_92 = arith.constant 0 : index
      %c0_93 = arith.constant 0 : index
      %191 = vector.load %arg4[%c0_92, %c0_93] : memref<8x128xf32, #tpu.memory_space<vmem>>, vector<8x128xf32>
      %c0_94 = arith.constant 0 : index
      %c0_95 = arith.constant 0 : index
      %192 = vector.load %arg6[%c0_94, %c0_95] : memref<8x128xf32, #tpu.memory_space<vmem>>, vector<8x128xf32>
      tpu.vector_store %arg6[%c0_94, %c0_95], %191 {strides = array<i32>} : memref<8x128xf32, #tpu.memory_space<vmem>>, vector<8x128xf32>,
    } else {
    }
    %c16_i32 = arith.constant 16 : i32
    %3 = arith.muli %arg1, %c16_i32 : i32
    %4 = tpu.assume_multiple %3, 16 : i32
    %5 = arith.index_cast %4 : i32 to index
    %c0 = arith.constant 0 : index
    %c0_1 = arith.constant 0 : index
    %6 = vector.load %arg2[%5, %c0, %c0_1] : memref<16x8x1xf32, #tpu.memory_space<vmem>>, vector<16x8x1xf32>
    %c0_2 = arith.constant 0 : index
    %c0_3 = arith.constant 0 : index
    %7 = vector.load %arg3[%c0_2, %c0_3] : memref<8x128xf32, #tpu.memory_space<vmem>>, vector<8x128xf32>
    %8 = vector.shape_cast %7 : vector<8x128xf32> to vector<1x8x128xf32>
    %9 = vector.broadcast %6 : vector<16x8x1xf32> to vector<16x8x128xf32>
    %10 = vector.broadcast %8 : vector<1x8x128xf32> to vector<16x8x128xf32>
    %11 = arith.mulf %9, %10 : vector<16x8x128xf32>
    %c0_4 = arith.constant 0 : index
    %c0_5 = arith.constant 0 : index
    %c0_6 = arith.constant 0 : index
    %12 = vector.load %arg7[%c0_4, %c0_5, %c0_6] : memref<16x8x128xf32, #tpu.memory_space<vmem>>, vector<16x8x128xf32>
    tpu.vector_store %arg7[%c0_4, %c0_5, %c0_6], %11 {strides = array<i32>} : memref<16x8x128xf32, #tpu.memory_space<vmem>>, vector<16x8x128xf32>,
    %c0_7 = arith.constant 0 : index
    %c0_8 = arith.constant 0 : index
    %13 = vector.load %arg6[%c0_7, %c0_8] : memref<8x128xf32, #tpu.memory_space<vmem>>, vector<8x128xf32>
    %c0_i32_9 = arith.constant 0 : i32
    %14 = arith.index_cast %c0_i32_9 : i32 to index
    %c0_10 = arith.constant 0 : index
    %c0_11 = arith.constant 0 : index
    %15 = vector.load %arg7[%14, %c0_10, %c0_11] : memref<16x8x128xf32, #tpu.memory_space<vmem>>, vector<1x8x128xf32>
    %16 = vector.shape_cast %15 : vector<1x8x128xf32> to vector<8x128xf32>
    %cst = arith.constant 8.000000e-01 : f32
    %17 = vector.broadcast %cst : f32 to vector<8x128xf32>
    %18 = arith.mulf %17, %13 : vector<8x128xf32>
    %19 = arith.addf %16, %18 : vector<8x128xf32>
    %20 = math.tanh %19 : vector<8x128xf32>
    %21 = arith.index_cast %c0_i32_9 : i32 to index
    %c0_12 = arith.constant 0 : index
    %c0_13 = arith.constant 0 : index
    %22 = vector.load %arg5[%21, %c0_12, %c0_13] : memref<16x8x128xf32, #tpu.memory_space<vmem>>, vector<1x8x128xf32>
    %23 = vector.shape_cast %22 : vector<1x8x128xf32> to vector<8x128xf32>
    %24 = vector.shape_cast %20 : vector<8x128xf32> to vector<1x8x128xf32>
    tpu.vector_store %arg5[%21, %c0_12, %c0_13], %24 {strides = array<i32>} : memref<16x8x128xf32, #tpu.memory_space<vmem>>, vector<1x8x128xf32>,
    %c1_i32 = arith.constant 1 : i32
    %25 = arith.index_cast %c1_i32 : i32 to index
    %c0_14 = arith.constant 0 : index
    %c0_15 = arith.constant 0 : index
    %26 = vector.load %arg7[%25, %c0_14, %c0_15] : memref<16x8x128xf32, #tpu.memory_space<vmem>>, vector<1x8x128xf32>
    %27 = vector.shape_cast %26 : vector<1x8x128xf32> to vector<8x128xf32>
    %cst_16 = arith.constant 8.000000e-01 : f32
    %28 = vector.broadcast %cst_16 : f32 to vector<8x128xf32>
    %29 = arith.mulf %28, %20 : vector<8x128xf32>
    %30 = arith.addf %27, %29 : vector<8x128xf32>
    %31 = math.tanh %30 : vector<8x128xf32>
    %32 = arith.index_cast %c1_i32 : i32 to index
    %c0_17 = arith.constant 0 : index
    %c0_18 = arith.constant 0 : index
    %33 = vector.load %arg5[%32, %c0_17, %c0_18] : memref<16x8x128xf32, #tpu.memory_space<vmem>>, vector<1x8x128xf32>
    %34 = vector.shape_cast %33 : vector<1x8x128xf32> to vector<8x128xf32>
    %35 = vector.shape_cast %31 : vector<8x128xf32> to vector<1x8x128xf32>
    tpu.vector_store %arg5[%32, %c0_17, %c0_18], %35 {strides = array<i32>} : memref<16x8x128xf32, #tpu.memory_space<vmem>>, vector<1x8x128xf32>,
    %c2_i32 = arith.constant 2 : i32
    %36 = arith.index_cast %c2_i32 : i32 to index
    %c0_19 = arith.constant 0 : index
    %c0_20 = arith.constant 0 : index
    %37 = vector.load %arg7[%36, %c0_19, %c0_20] : memref<16x8x128xf32, #tpu.memory_space<vmem>>, vector<1x8x128xf32>
    %38 = vector.shape_cast %37 : vector<1x8x128xf32> to vector<8x128xf32>
    %cst_21 = arith.constant 8.000000e-01 : f32
    %39 = vector.broadcast %cst_21 : f32 to vector<8x128xf32>
    %40 = arith.mulf %39, %31 : vector<8x128xf32>
    %41 = arith.addf %38, %40 : vector<8x128xf32>
    %42 = math.tanh %41 : vector<8x128xf32>
    %43 = arith.index_cast %c2_i32 : i32 to index
    %c0_22 = arith.constant 0 : index
    %c0_23 = arith.constant 0 : index
    %44 = vector.load %arg5[%43, %c0_22, %c0_23] : memref<16x8x128xf32, #tpu.memory_space<vmem>>, vector<1x8x128xf32>
    %45 = vector.shape_cast %44 : vector<1x8x128xf32> to vector<8x128xf32>
    %46 = vector.shape_cast %42 : vector<8x128xf32> to vector<1x8x128xf32>
    tpu.vector_store %arg5[%43, %c0_22, %c0_23], %46 {strides = array<i32>} : memref<16x8x128xf32, #tpu.memory_space<vmem>>, vector<1x8x128xf32>,
    %c3_i32 = arith.constant 3 : i32
    %47 = arith.index_cast %c3_i32 : i32 to index
    %c0_24 = arith.constant 0 : index
    %c0_25 = arith.constant 0 : index
    %48 = vector.load %arg7[%47, %c0_24, %c0_25] : memref<16x8x128xf32, #tpu.memory_space<vmem>>, vector<1x8x128xf32>
    %49 = vector.shape_cast %48 : vector<1x8x128xf32> to vector<8x128xf32>
    %cst_26 = arith.constant 8.000000e-01 : f32
    %50 = vector.broadcast %cst_26 : f32 to vector<8x128xf32>
    %51 = arith.mulf %50, %42 : vector<8x128xf32>
    %52 = arith.addf %49, %51 : vector<8x128xf32>
    %53 = math.tanh %52 : vector<8x128xf32>
    %54 = arith.index_cast %c3_i32 : i32 to index
    %c0_27 = arith.constant 0 : index
    %c0_28 = arith.constant 0 : index
    %55 = vector.load %arg5[%54, %c0_27, %c0_28] : memref<16x8x128xf32, #tpu.memory_space<vmem>>, vector<1x8x128xf32>
    %56 = vector.shape_cast %55 : vector<1x8x128xf32> to vector<8x128xf32>
    %57 = vector.shape_cast %53 : vector<8x128xf32> to vector<1x8x128xf32>
    tpu.vector_store %arg5[%54, %c0_27, %c0_28], %57 {strides = array<i32>} : memref<16x8x128xf32, #tpu.memory_space<vmem>>, vector<1x8x128xf32>,
    %c4_i32 = arith.constant 4 : i32
    %58 = arith.index_cast %c4_i32 : i32 to index
    %c0_29 = arith.constant 0 : index
    %c0_30 = arith.constant 0 : index
    %59 = vector.load %arg7[%58, %c0_29, %c0_30] : memref<16x8x128xf32, #tpu.memory_space<vmem>>, vector<1x8x128xf32>
    %60 = vector.shape_cast %59 : vector<1x8x128xf32> to vector<8x128xf32>
    %cst_31 = arith.constant 8.000000e-01 : f32
    %61 = vector.broadcast %cst_31 : f32 to vector<8x128xf32>
    %62 = arith.mulf %61, %53 : vector<8x128xf32>
    %63 = arith.addf %60, %62 : vector<8x128xf32>
    %64 = math.tanh %63 : vector<8x128xf32>
    %65 = arith.index_cast %c4_i32 : i32 to index
    %c0_32 = arith.constant 0 : index
    %c0_33 = arith.constant 0 : index
    %66 = vector.load %arg5[%65, %c0_32, %c0_33] : memref<16x8x128xf32, #tpu.memory_space<vmem>>, vector<1x8x128xf32>
    %67 = vector.shape_cast %66 : vector<1x8x128xf32> to vector<8x128xf32>
    %68 = vector.shape_cast %64 : vector<8x128xf32> to vector<1x8x128xf32>
    tpu.vector_store %arg5[%65, %c0_32, %c0_33], %68 {strides = array<i32>} : memref<16x8x128xf32, #tpu.memory_space<vmem>>, vector<1x8x128xf32>,
    %c5_i32 = arith.constant 5 : i32
    %69 = arith.index_cast %c5_i32 : i32 to index
    %c0_34 = arith.constant 0 : index
    %c0_35 = arith.constant 0 : index
    %70 = vector.load %arg7[%69, %c0_34, %c0_35] : memref<16x8x128xf32, #tpu.memory_space<vmem>>, vector<1x8x128xf32>
    %71 = vector.shape_cast %70 : vector<1x8x128xf32> to vector<8x128xf32>
    %cst_36 = arith.constant 8.000000e-01 : f32
    %72 = vector.broadcast %cst_36 : f32 to vector<8x128xf32>
    %73 = arith.mulf %72, %64 : vector<8x128xf32>
    %74 = arith.addf %71, %73 : vector<8x128xf32>
    %75 = math.tanh %74 : vector<8x128xf32>
    %76 = arith.index_cast %c5_i32 : i32 to index
    %c0_37 = arith.constant 0 : index
    %c0_38 = arith.constant 0 : index
    %77 = vector.load %arg5[%76, %c0_37, %c0_38] : memref<16x8x128xf32, #tpu.memory_space<vmem>>, vector<1x8x128xf32>
    %78 = vector.shape_cast %77 : vector<1x8x128xf32> to vector<8x128xf32>
    %79 = vector.shape_cast %75 : vector<8x128xf32> to vector<1x8x128xf32>
    tpu.vector_store %arg5[%76, %c0_37, %c0_38], %79 {strides = array<i32>} : memref<16x8x128xf32, #tpu.memory_space<vmem>>, vector<1x8x128xf32>,
    %c6_i32 = arith.constant 6 : i32
    %80 = arith.index_cast %c6_i32 : i32 to index
    %c0_39 = arith.constant 0 : index
    %c0_40 = arith.constant 0 : index
    %81 = vector.load %arg7[%80, %c0_39, %c0_40] : memref<16x8x128xf32, #tpu.memory_space<vmem>>, vector<1x8x128xf32>
    %82 = vector.shape_cast %81 : vector<1x8x128xf32> to vector<8x128xf32>
    %cst_41 = arith.constant 8.000000e-01 : f32
    %83 = vector.broadcast %cst_41 : f32 to vector<8x128xf32>
    %84 = arith.mulf %83, %75 : vector<8x128xf32>
    %85 = arith.addf %82, %84 : vector<8x128xf32>
    %86 = math.tanh %85 : vector<8x128xf32>
    %87 = arith.index_cast %c6_i32 : i32 to index
    %c0_42 = arith.constant 0 : index
    %c0_43 = arith.constant 0 : index
    %88 = vector.load %arg5[%87, %c0_42, %c0_43] : memref<16x8x128xf32, #tpu.memory_space<vmem>>, vector<1x8x128xf32>
    %89 = vector.shape_cast %88 : vector<1x8x128xf32> to vector<8x128xf32>
    %90 = vector.shape_cast %86 : vector<8x128xf32> to vector<1x8x128xf32>
    tpu.vector_store %arg5[%87, %c0_42, %c0_43], %90 {strides = array<i32>} : memref<16x8x128xf32, #tpu.memory_space<vmem>>, vector<1x8x128xf32>,
    %c7_i32 = arith.constant 7 : i32
    %91 = arith.index_cast %c7_i32 : i32 to index
    %c0_44 = arith.constant 0 : index
    %c0_45 = arith.constant 0 : index
    %92 = vector.load %arg7[%91, %c0_44, %c0_45] : memref<16x8x128xf32, #tpu.memory_space<vmem>>, vector<1x8x128xf32>
    %93 = vector.shape_cast %92 : vector<1x8x128xf32> to vector<8x128xf32>
    %cst_46 = arith.constant 8.000000e-01 : f32
    %94 = vector.broadcast %cst_46 : f32 to vector<8x128xf32>
    %95 = arith.mulf %94, %86 : vector<8x128xf32>
    %96 = arith.addf %93, %95 : vector<8x128xf32>
    %97 = math.tanh %96 : vector<8x128xf32>
    %98 = arith.index_cast %c7_i32 : i32 to index
    %c0_47 = arith.constant 0 : index
    %c0_48 = arith.constant 0 : index
    %99 = vector.load %arg5[%98, %c0_47, %c0_48] : memref<16x8x128xf32, #tpu.memory_space<vmem>>, vector<1x8x128xf32>
    %100 = vector.shape_cast %99 : vector<1x8x128xf32> to vector<8x128xf32>
    %101 = vector.shape_cast %97 : vector<8x128xf32> to vector<1x8x128xf32>
    tpu.vector_store %arg5[%98, %c0_47, %c0_48], %101 {strides = array<i32>} : memref<16x8x128xf32, #tpu.memory_space<vmem>>, vector<1x8x128xf32>,
    %c8_i32 = arith.constant 8 : i32
    %102 = arith.index_cast %c8_i32 : i32 to index
    %c0_49 = arith.constant 0 : index
    %c0_50 = arith.constant 0 : index
    %103 = vector.load %arg7[%102, %c0_49, %c0_50] : memref<16x8x128xf32, #tpu.memory_space<vmem>>, vector<1x8x128xf32>
    %104 = vector.shape_cast %103 : vector<1x8x128xf32> to vector<8x128xf32>
    %cst_51 = arith.constant 8.000000e-01 : f32
    %105 = vector.broadcast %cst_51 : f32 to vector<8x128xf32>
    %106 = arith.mulf %105, %97 : vector<8x128xf32>
    %107 = arith.addf %104, %106 : vector<8x128xf32>
    %108 = math.tanh %107 : vector<8x128xf32>
    %109 = arith.index_cast %c8_i32 : i32 to index
    %c0_52 = arith.constant 0 : index
    %c0_53 = arith.constant 0 : index
    %110 = vector.load %arg5[%109, %c0_52, %c0_53] : memref<16x8x128xf32, #tpu.memory_space<vmem>>, vector<1x8x128xf32>
    %111 = vector.shape_cast %110 : vector<1x8x128xf32> to vector<8x128xf32>
    %112 = vector.shape_cast %108 : vector<8x128xf32> to vector<1x8x128xf32>
    tpu.vector_store %arg5[%109, %c0_52, %c0_53], %112 {strides = array<i32>} : memref<16x8x128xf32, #tpu.memory_space<vmem>>, vector<1x8x128xf32>,
    %c9_i32 = arith.constant 9 : i32
    %113 = arith.index_cast %c9_i32 : i32 to index
    %c0_54 = arith.constant 0 : index
    %c0_55 = arith.constant 0 : index
    %114 = vector.load %arg7[%113, %c0_54, %c0_55] : memref<16x8x128xf32, #tpu.memory_space<vmem>>, vector<1x8x128xf32>
    %115 = vector.shape_cast %114 : vector<1x8x128xf32> to vector<8x128xf32>
    %cst_56 = arith.constant 8.000000e-01 : f32
    %116 = vector.broadcast %cst_56 : f32 to vector<8x128xf32>
    %117 = arith.mulf %116, %108 : vector<8x128xf32>
    %118 = arith.addf %115, %117 : vector<8x128xf32>
    %119 = math.tanh %118 : vector<8x128xf32>
    %120 = arith.index_cast %c9_i32 : i32 to index
    %c0_57 = arith.constant 0 : index
    %c0_58 = arith.constant 0 : index
    %121 = vector.load %arg5[%120, %c0_57, %c0_58] : memref<16x8x128xf32, #tpu.memory_space<vmem>>, vector<1x8x128xf32>
    %122 = vector.shape_cast %121 : vector<1x8x128xf32> to vector<8x128xf32>
    %123 = vector.shape_cast %119 : vector<8x128xf32> to vector<1x8x128xf32>
    tpu.vector_store %arg5[%120, %c0_57, %c0_58], %123 {strides = array<i32>} : memref<16x8x128xf32, #tpu.memory_space<vmem>>, vector<1x8x128xf32>,
    %c10_i32 = arith.constant 10 : i32
    %124 = arith.index_cast %c10_i32 : i32 to index
    %c0_59 = arith.constant 0 : index
    %c0_60 = arith.constant 0 : index
    %125 = vector.load %arg7[%124, %c0_59, %c0_60] : memref<16x8x128xf32, #tpu.memory_space<vmem>>, vector<1x8x128xf32>
    %126 = vector.shape_cast %125 : vector<1x8x128xf32> to vector<8x128xf32>
    %cst_61 = arith.constant 8.000000e-01 : f32
    %127 = vector.broadcast %cst_61 : f32 to vector<8x128xf32>
    %128 = arith.mulf %127, %119 : vector<8x128xf32>
    %129 = arith.addf %126, %128 : vector<8x128xf32>
    %130 = math.tanh %129 : vector<8x128xf32>
    %131 = arith.index_cast %c10_i32 : i32 to index
    %c0_62 = arith.constant 0 : index
    %c0_63 = arith.constant 0 : index
    %132 = vector.load %arg5[%131, %c0_62, %c0_63] : memref<16x8x128xf32, #tpu.memory_space<vmem>>, vector<1x8x128xf32>
    %133 = vector.shape_cast %132 : vector<1x8x128xf32> to vector<8x128xf32>
    %134 = vector.shape_cast %130 : vector<8x128xf32> to vector<1x8x128xf32>
    tpu.vector_store %arg5[%131, %c0_62, %c0_63], %134 {strides = array<i32>} : memref<16x8x128xf32, #tpu.memory_space<vmem>>, vector<1x8x128xf32>,
    %c11_i32 = arith.constant 11 : i32
    %135 = arith.index_cast %c11_i32 : i32 to index
    %c0_64 = arith.constant 0 : index
    %c0_65 = arith.constant 0 : index
    %136 = vector.load %arg7[%135, %c0_64, %c0_65] : memref<16x8x128xf32, #tpu.memory_space<vmem>>, vector<1x8x128xf32>
    %137 = vector.shape_cast %136 : vector<1x8x128xf32> to vector<8x128xf32>
    %cst_66 = arith.constant 8.000000e-01 : f32
    %138 = vector.broadcast %cst_66 : f32 to vector<8x128xf32>
    %139 = arith.mulf %138, %130 : vector<8x128xf32>
    %140 = arith.addf %137, %139 : vector<8x128xf32>
    %141 = math.tanh %140 : vector<8x128xf32>
    %142 = arith.index_cast %c11_i32 : i32 to index
    %c0_67 = arith.constant 0 : index
    %c0_68 = arith.constant 0 : index
    %143 = vector.load %arg5[%142, %c0_67, %c0_68] : memref<16x8x128xf32, #tpu.memory_space<vmem>>, vector<1x8x128xf32>
    %144 = vector.shape_cast %143 : vector<1x8x128xf32> to vector<8x128xf32>
    %145 = vector.shape_cast %141 : vector<8x128xf32> to vector<1x8x128xf32>
    tpu.vector_store %arg5[%142, %c0_67, %c0_68], %145 {strides = array<i32>} : memref<16x8x128xf32, #tpu.memory_space<vmem>>, vector<1x8x128xf32>,
    %c12_i32 = arith.constant 12 : i32
    %146 = arith.index_cast %c12_i32 : i32 to index
    %c0_69 = arith.constant 0 : index
    %c0_70 = arith.constant 0 : index
    %147 = vector.load %arg7[%146, %c0_69, %c0_70] : memref<16x8x128xf32, #tpu.memory_space<vmem>>, vector<1x8x128xf32>
    %148 = vector.shape_cast %147 : vector<1x8x128xf32> to vector<8x128xf32>
    %cst_71 = arith.constant 8.000000e-01 : f32
    %149 = vector.broadcast %cst_71 : f32 to vector<8x128xf32>
    %150 = arith.mulf %149, %141 : vector<8x128xf32>
    %151 = arith.addf %148, %150 : vector<8x128xf32>
    %152 = math.tanh %151 : vector<8x128xf32>
    %153 = arith.index_cast %c12_i32 : i32 to index
    %c0_72 = arith.constant 0 : index
    %c0_73 = arith.constant 0 : index
    %154 = vector.load %arg5[%153, %c0_72, %c0_73] : memref<16x8x128xf32, #tpu.memory_space<vmem>>, vector<1x8x128xf32>
    %155 = vector.shape_cast %154 : vector<1x8x128xf32> to vector<8x128xf32>
    %156 = vector.shape_cast %152 : vector<8x128xf32> to vector<1x8x128xf32>
    tpu.vector_store %arg5[%153, %c0_72, %c0_73], %156 {strides = array<i32>} : memref<16x8x128xf32, #tpu.memory_space<vmem>>, vector<1x8x128xf32>,
    %c13_i32 = arith.constant 13 : i32
    %157 = arith.index_cast %c13_i32 : i32 to index
    %c0_74 = arith.constant 0 : index
    %c0_75 = arith.constant 0 : index
    %158 = vector.load %arg7[%157, %c0_74, %c0_75] : memref<16x8x128xf32, #tpu.memory_space<vmem>>, vector<1x8x128xf32>
    %159 = vector.shape_cast %158 : vector<1x8x128xf32> to vector<8x128xf32>
    %cst_76 = arith.constant 8.000000e-01 : f32
    %160 = vector.broadcast %cst_76 : f32 to vector<8x128xf32>
    %161 = arith.mulf %160, %152 : vector<8x128xf32>
    %162 = arith.addf %159, %161 : vector<8x128xf32>
    %163 = math.tanh %162 : vector<8x128xf32>
    %164 = arith.index_cast %c13_i32 : i32 to index
    %c0_77 = arith.constant 0 : index
    %c0_78 = arith.constant 0 : index
    %165 = vector.load %arg5[%164, %c0_77, %c0_78] : memref<16x8x128xf32, #tpu.memory_space<vmem>>, vector<1x8x128xf32>
    %166 = vector.shape_cast %165 : vector<1x8x128xf32> to vector<8x128xf32>
    %167 = vector.shape_cast %163 : vector<8x128xf32> to vector<1x8x128xf32>
    tpu.vector_store %arg5[%164, %c0_77, %c0_78], %167 {strides = array<i32>} : memref<16x8x128xf32, #tpu.memory_space<vmem>>, vector<1x8x128xf32>,
    %c14_i32 = arith.constant 14 : i32
    %168 = arith.index_cast %c14_i32 : i32 to index
    %c0_79 = arith.constant 0 : index
    %c0_80 = arith.constant 0 : index
    %169 = vector.load %arg7[%168, %c0_79, %c0_80] : memref<16x8x128xf32, #tpu.memory_space<vmem>>, vector<1x8x128xf32>
    %170 = vector.shape_cast %169 : vector<1x8x128xf32> to vector<8x128xf32>
    %cst_81 = arith.constant 8.000000e-01 : f32
    %171 = vector.broadcast %cst_81 : f32 to vector<8x128xf32>
    %172 = arith.mulf %171, %163 : vector<8x128xf32>
    %173 = arith.addf %170, %172 : vector<8x128xf32>
    %174 = math.tanh %173 : vector<8x128xf32>
    %175 = arith.index_cast %c14_i32 : i32 to index
    %c0_82 = arith.constant 0 : index
    %c0_83 = arith.constant 0 : index
    %176 = vector.load %arg5[%175, %c0_82, %c0_83] : memref<16x8x128xf32, #tpu.memory_space<vmem>>, vector<1x8x128xf32>
    %177 = vector.shape_cast %176 : vector<1x8x128xf32> to vector<8x128xf32>
    %178 = vector.shape_cast %174 : vector<8x128xf32> to vector<1x8x128xf32>
    tpu.vector_store %arg5[%175, %c0_82, %c0_83], %178 {strides = array<i32>} : memref<16x8x128xf32, #tpu.memory_space<vmem>>, vector<1x8x128xf32>,
    %c15_i32 = arith.constant 15 : i32
    %179 = arith.index_cast %c15_i32 : i32 to index
    %c0_84 = arith.constant 0 : index
    %c0_85 = arith.constant 0 : index
    %180 = vector.load %arg7[%179, %c0_84, %c0_85] : memref<16x8x128xf32, #tpu.memory_space<vmem>>, vector<1x8x128xf32>
    %181 = vector.shape_cast %180 : vector<1x8x128xf32> to vector<8x128xf32>
    %cst_86 = arith.constant 8.000000e-01 : f32
    %182 = vector.broadcast %cst_86 : f32 to vector<8x128xf32>
    %183 = arith.mulf %182, %174 : vector<8x128xf32>
    %184 = arith.addf %181, %183 : vector<8x128xf32>
    %185 = math.tanh %184 : vector<8x128xf32>
    %186 = arith.index_cast %c15_i32 : i32 to index
    %c0_87 = arith.constant 0 : index
    %c0_88 = arith.constant 0 : index
    %187 = vector.load %arg5[%186, %c0_87, %c0_88] : memref<16x8x128xf32, #tpu.memory_space<vmem>>, vector<1x8x128xf32>
    %188 = vector.shape_cast %187 : vector<1x8x128xf32> to vector<8x128xf32>
    %189 = vector.shape_cast %185 : vector<8x128xf32> to vector<1x8x128xf32>
    tpu.vector_store %arg5[%186, %c0_87, %c0_88], %189 {strides = array<i32>} : memref<16x8x128xf32, #tpu.memory_space<vmem>>, vector<1x8x128xf32>,
    %c16_i32_89 = arith.constant 16 : i32
    %c0_90 = arith.constant 0 : index
    %c0_91 = arith.constant 0 : index
    %190 = vector.load %arg6[%c0_90, %c0_91] : memref<8x128xf32, #tpu.memory_space<vmem>>, vector<8x128xf32>
    tpu.vector_store %arg6[%c0_90, %c0_91], %185 {strides = array<i32>} : memref<8x128xf32, #tpu.memory_space<vmem>>, vector<8x128xf32>,
    return
  }
  func.func @transform_0(%arg0: i32, %arg1: i32) -> (i32, i32, i32) {
    %c0_i32 = arith.constant 0 : i32
    %c0_i32_0 = arith.constant 0 : i32
    %c0_i32_1 = arith.constant 0 : i32
    %c0_i32_2 = arith.constant 0 : i32
    return %c0_i32, %c0_i32_0, %c0_i32_1 : i32, i32, i32
  }
  func.func @transform_1(%arg0: i32, %arg1: i32) -> (i32, i32) {
    %c0_i32 = arith.constant 0 : i32
    %c0_i32_0 = arith.constant 0 : i32
    return %c0_i32, %arg0 : i32, i32
  }
  func.func @transform_2(%arg0: i32, %arg1: i32) -> (i32, i32) {
    %c0_i32 = arith.constant 0 : i32
    %c0_i32_0 = arith.constant 0 : i32
    return %c0_i32, %arg0 : i32, i32
  }
  func.func @transform_3(%arg0: i32, %arg1: i32) -> (i32, i32, i32) {
    %c0_i32 = arith.constant 0 : i32
    %c0_i32_0 = arith.constant 0 : i32
    return %arg1, %c0_i32, %arg0 : i32, i32, i32
  }
}

</mosaic_0001>

<bundles_post_ra>
// kernel: tpu_custom_call.1
= control target key start
LH: loop header
LB: loop body
LE: loop exit
PB: predicated region body
PF: predicated region fallthrough
CT: control target
= control target key end

     0   :  { %v343_v2 = vmov 0   ;;  %s451_s0 = inlined_call_operand.vmem [shape: f32[16,8,1], index: 0, kind: input, shape index: {}]   ;;  %s452_s1 = inlined_call_operand.vmem [shape: f32[8,128], index: 1, kind: input, shape index: {}]   ;;  %s453_s2 = inlined_call_operand.vmem [shape: f32[8,128], index: 2, kind: input, shape index: {}]   ;;  %s454_s3 = inlined_call_operand.hbm [shape: f32[16,8,128], index: 3, kind: output, shape index: {}]  }
   0x1   :  { %v24_v0 = vld [vmem:[%s451_s0] sm:$0xff]  ;;  %v26_v1 = vld [vmem:[%s451_s0 + $0x10] sm:$0xff]  ;;  %285 = vset.pattern.permute.xlu0 %v343_v2  ;;  %286 = vset.pattern.permute.xlu1 %v343_v2  ;;  %v25_v3 = vld [vmem:[%s451_s0 + $0x8] sm:$0xff] }
   0x2   :  { %43 = vperm.xlu0 %285, %v24_v0   ;;  %53 = vperm.xlu1 %286, %v26_v1   ;;  %v27_v4 = vld [vmem:[%s451_s0 + $0x18] sm:$0xff] }
   0x6   :  { %48 = vperm.xlu0 %285, %v25_v3   ;;  %58 = vperm.xlu1 %286, %v27_v4  }
   0x7   :  { %8 = vsyncpa [#allocation5], 0  ;;  %v28_v5 = vld [vmem:[%s451_s0 + $0x20] sm:$0xff]  ;;  %v29_v6 = vld [vmem:[%s451_s0 + $0x28] sm:$0xff] }
   0x8   :  { %v30_v7 = vld [vmem:[%s451_s0 + $0x30] sm:$0xff]  ;;  %v31_v8 = vld [vmem:[%s451_s0 + $0x38] sm:$0xff]  ;;  %v32_v9 = vld [vmem:[%s451_s0 + $0x40] sm:$0xff] }
   0x9   :  { %v33_v10 = vld [vmem:[%s451_s0 + $0x48] sm:$0xff]  ;;  %v34_v11 = vld [vmem:[%s451_s0 + $0x50] sm:$0xff]  ;;  %v35_v12 = vld [vmem:[%s451_s0 + $0x58] sm:$0xff] }
   0xa   :  { %63 = vperm.xlu0 %285, %v28_v5   ;;  %68 = vperm.xlu1 %286, %v29_v6   ;;  %v36_v13 = vld [vmem:[%s451_s0 + $0x60] sm:$0xff]  ;;  %v37_v14 = vld [vmem:[%s451_s0 + $0x68] sm:$0xff]  ;;  %v38_v15 = vld [vmem:[%s451_s0 + $0x70] sm:$0xff] }
   0xb   :  { %v39_v16 = vld [vmem:[%s451_s0 + $0x78] sm:$0xff]  ;;  %v19_v17 = vld [vmem:[%s453_s2] sm:$0xff]  ;;  %s344_s0 = smov [#allocation4]  }
   0xc   :  { %v421_v18 = vld [vmem:[%s452_s1] sm:$0xff]  ;;  %v155_v19 = vmul.f32 0.8, %v19_v17  ;;  %s270_s1 = sshll.u32 %s344_s0, 4  ;;  %s271_s1 = int_to_ptr.vmem [resolvable:$true] %s270_s1 }
   0xd   :  { %s319_s2 = scalar_lea.vmem %s271_s1, 2048  ;;  %p324_p1 = scmp.lt.s32.totalorder %s271_s1, %s271_s1 }
   0xe   :  { %73 = vperm.xlu0 %285, %v30_v7   ;;  %78 = vperm.xlu1 %286, %v31_v8   ;;  %p320_p0 = scmp.ne.s32.totalorder %s271_s1, %s319_s2  ;;  %p325_p2 = scmp.lt.s32.totalorder %s319_s2, %s319_s2 }
  0x10   :  { %p326_p3 = por %p325_p2, %p324_p1 }
  0x12   :  { %83 = vperm.xlu0 %285, %v32_v9   ;;  %88 = vperm.xlu1 %286, %v33_v10   ;;  %p327_p4 = pnand %p326_p3, %p320_p0 }
  0x16   :  { %93 = vperm.xlu0 %285, %v34_v11   ;;  %98 = vperm.xlu1 %286, %v35_v12  }
  0x1a   :  { %103 = vperm.xlu0 %285, %v36_v13   ;;  %108 = vperm.xlu1 %286, %v37_v14  }
  0x1e   :  { %113 = vperm.xlu0 %285, %v38_v15   ;;  %118 = vperm.xlu1 %286, %v39_v16  }
  0x81   :  { %v44_v20 = vpop.permute.xlu0 %43  ;;  %v54_v28 = vpop.permute.xlu1 %53 }
  0x82   :  { %v121_v21 = vmul.f32 %v44_v20, %v421_v18  ;;  %v123_v29 = vmul.f32 %v54_v28, %v421_v18 }
  0x84   :  { %v156_v22 = vadd.f32 %v155_v19, %v121_v21 }
  0x85   :  { %v49_v23 = vpop.permute.xlu0 %48  ;;  %v59_v34 = vpop.permute.xlu1 %58 }
  0x86   :  { %287 = vtanh.f32 %v156_v22  ;;  %v122_v25 = vmul.f32 %v49_v23, %v421_v18  ;;  %v124_v35 = vmul.f32 %v59_v34, %v421_v18 }
  0x89   :  { %v64_v38 = vpop.permute.xlu0 %63  ;;  %v69_v44 = vpop.permute.xlu1 %68 }
  0x8a   :  { %v125_v40 = vmul.f32 %v64_v38, %v421_v18  ;;  %v126_v45 = vmul.f32 %v69_v44, %v421_v18 }
  0x8d   :  { %v74_v48 = vpop.permute.xlu0 %73  ;;  %v79_v54 = vpop.permute.xlu1 %78 }
  0x8e   :  { %v127_v50 = vmul.f32 %v74_v48, %v421_v18  ;;  %v128_v55 = vmul.f32 %v79_v54, %v421_v18 }
  0x90   :  { %v288_v24 = vpop.eup %287 }
  0x91   :  { %158 = vst [vmem:[#allocation4] sm:$0xff] %v288_v24  ;;  %v161_v26 = vmul.f32 0.8, %v288_v24  ;;  %v84_v58 = vpop.permute.xlu0 %83  ;;  %v89_v0 = vpop.permute.xlu1 %88 }
  0x92   :  { %v129_v60 = vmul.f32 %v84_v58, %v421_v18  ;;  %v130_v1 = vmul.f32 %v89_v0, %v421_v18 }
  0x93   :  { %v162_v27 = vadd.f32 %v161_v26, %v122_v25 }
  0x95   :  { %289 = vtanh.f32 %v162_v27  ;;  %v94_v4 = vpop.permute.xlu0 %93  ;;  %v99_v10 = vpop.permute.xlu1 %98 }
  0x96   :  { %v131_v6 = vmul.f32 %v94_v4, %v421_v18  ;;  %v132_v11 = vmul.f32 %v99_v10, %v421_v18 }
  0x99   :  { %v104_v14 = vpop.permute.xlu0 %103  ;;  %v109_v21 = vpop.permute.xlu1 %108 }
  0x9a   :  { %v133_v16 = vmul.f32 %v104_v14, %v421_v18  ;;  %v134_v22 = vmul.f32 %v109_v21, %v421_v18 }
  0x9d   :  { %v114_v25 = vpop.permute.xlu0 %113 }
  0x9e   :  { %v135_v27 = vmul.f32 %v114_v25, %v421_v18 }
  0x9f   :  { %v290_v30 = vpop.eup %289 }
  0xa0   :  { %165 = vst [vmem:[#allocation4 + $0x8] sm:$0xff] %v290_v30  ;;  %v168_v31 = vmul.f32 0.8, %v290_v30  ;;  %v119_v30 = vpop.permute.xlu1 %118 }
  0xa2   :  { %v169_v32 = vadd.f32 %v168_v31, %v123_v29 }
  0xa4   :  { %291 = vtanh.f32 %v169_v32  ;;  %v136_v32 = vmul.f32 %v119_v30, %v421_v18 }
  0xae   :  { %v292_v33 = vpop.eup %291 }
  0xaf   :  { %172 = vst [vmem:[#allocation4 + $0x10] sm:$0xff] %v292_v33  ;;  %v175_v36 = vmul.f32 0.8, %v292_v33 }
  0xb1   :  { %v176_v37 = vadd.f32 %v175_v36, %v124_v35 }
  0xb3   :  { %293 = vtanh.f32 %v176_v37 }
  0xbd   :  { %v294_v39 = vpop.eup %293 }
  0xbe   :  { %179 = vst [vmem:[#allocation4 + $0x18] sm:$0xff] %v294_v39  ;;  %v182_v41 = vmul.f32 0.8, %v294_v39 }
  0xc0   :  { %v183_v42 = vadd.f32 %v182_v41, %v125_v40 }
  0xc2   :  { %295 = vtanh.f32 %v183_v42 }
  0xcc   :  { %v296_v43 = vpop.eup %295 }
  0xcd   :  { %186 = vst [vmem:[#allocation4 + $0x20] sm:$0xff] %v296_v43  ;;  %v189_v46 = vmul.f32 0.8, %v296_v43 }
  0xcf   :  { %v190_v47 = vadd.f32 %v189_v46, %v126_v45 }
  0xd1   :  { %297 = vtanh.f32 %v190_v47 }
  0xdb   :  { %v298_v49 = vpop.eup %297 }
  0xdc   :  { %193 = vst [vmem:[#allocation4 + $0x28] sm:$0xff] %v298_v49  ;;  %v196_v51 = vmul.f32 0.8, %v298_v49 }
  0xde   :  { %v197_v52 = vadd.f32 %v196_v51, %v127_v50 }
  0xe0   :  { %299 = vtanh.f32 %v197_v52 }
  0xea   :  { %v300_v53 = vpop.eup %299 }
  0xeb   :  { %200 = vst [vmem:[#allocation4 + $0x30] sm:$0xff] %v300_v53  ;;  %v203_v56 = vmul.f32 0.8, %v300_v53 }
  0xed   :  { %v204_v57 = vadd.f32 %v203_v56, %v128_v55 }
  0xef   :  { %301 = vtanh.f32 %v204_v57 }
  0xf9   :  { %v302_v59 = vpop.eup %301 }
  0xfa   :  { %207 = vst [vmem:[#allocation4 + $0x38] sm:$0xff] %v302_v59  ;;  %v210_v61 = vmul.f32 0.8, %v302_v59 }
  0xfc   :  { %v211_v62 = vadd.f32 %v210_v61, %v129_v60 }
  0xfe   :  { %303 = vtanh.f32 %v211_v62 }
 0x108   :  { %v304_v63 = vpop.eup %303 }
 0x109   :  { %214 = vst [vmem:[#allocation4 + $0x40] sm:$0xff] %v304_v63  ;;  %v217_v2 = vmul.f32 0.8, %v304_v63 }
 0x10b   :  { %v218_v3 = vadd.f32 %v217_v2, %v130_v1 }
 0x10d   :  { %305 = vtanh.f32 %v218_v3 }
 0x117   :  { %v306_v5 = vpop.eup %305 }
 0x118   :  { %221 = vst [vmem:[#allocation4 + $0x48] sm:$0xff] %v306_v5  ;;  %v224_v7 = vmul.f32 0.8, %v306_v5 }
 0x11a   :  { %v225_v8 = vadd.f32 %v224_v7, %v131_v6 }
 0x11c   :  { %307 = vtanh.f32 %v225_v8 }
 0x126   :  { %v308_v9 = vpop.eup %307 }
 0x127   :  { %228 = vst [vmem:[#allocation4 + $0x50] sm:$0xff] %v308_v9  ;;  %v231_v12 = vmul.f32 0.8, %v308_v9 }
 0x129   :  { %v232_v13 = vadd.f32 %v231_v12, %v132_v11 }
 0x12b   :  { %309 = vtanh.f32 %v232_v13 }
 0x135   :  { %v310_v15 = vpop.eup %309 }
 0x136   :  { %235 = vst [vmem:[#allocation4 + $0x58] sm:$0xff] %v310_v15  ;;  %v238_v17 = vmul.f32 0.8, %v310_v15 }
 0x138   :  { %v239_v19 = vadd.f32 %v238_v17, %v133_v16 }
 0x13a   :  { %311 = vtanh.f32 %v239_v19 }
 0x144   :  { %v312_v20 = vpop.eup %311 }
 0x145   :  { %242 = vst [vmem:[#allocation4 + $0x60] sm:$0xff] %v312_v20  ;;  %v245_v23 = vmul.f32 0.8, %v312_v20 }
 0x147   :  { %v246_v24 = vadd.f32 %v245_v23, %v134_v22 }
 0x149   :  { %313 = vtanh.f32 %v246_v24 }
 0x153   :  { %v314_v26 = vpop.eup %313 }
 0x154   :  { %249 = vst [vmem:[#allocation4 + $0x68] sm:$0xff] %v314_v26  ;;  %v252_v28 = vmul.f32 0.8, %v314_v26 }
 0x156   :  { %v253_v29 = vadd.f32 %v252_v28, %v135_v27 }
 0x158   :  { %315 = vtanh.f32 %v253_v29 }
 0x162   :  { %v316_v31 = vpop.eup %315 }
 0x163   :  { %256 = vst [vmem:[#allocation4 + $0x70] sm:$0xff] %v316_v31  ;;  %v259_v33 = vmul.f32 0.8, %v316_v31 }
 0x165   :  { %v260_v34 = vadd.f32 %v259_v33, %v136_v32 }
 0x167   :  { %317 = vtanh.f32 %v260_v34 }
 0x171   :  { %v318_v35 = vpop.eup %317 }
 0x172   :  { %263 = vst [vmem:[#allocation4 + $0x78] sm:$0xff] %v318_v35 }
 0x173   :  { %330 = shalt.err (!%p327_p4)
}
 0x174   :  { %s331_s23 = scalar_lea.hbm %s454_s3, 2048 }
 0x175   :  { %p332_p5 = scmp.ne.s32.totalorder %s454_s3, %s331_s23  ;;  %p335_p6 = scmp.lt.u32.totalorder %s331_s23, %s454_s3 }
 0x177   :  { %p337_p7 = pnand %p335_p6, %p332_p5 }
 0x179   :  { %340 = shalt.err (!%p337_p7)
}
 0x17a   :  { %s345_s28 = smov 128   ;;  %s346_s29 = smov 8  }
 0x17b   :  { %276 = dma.vmem_to_hbm [thread:$0]  %s271_s1, 2048, %s454_s3, [#allocation5], %s345_s28, %s345_s28, %s346_s29  }
 0x17c   :  { %341 = dma.done.wait [#allocation5], 2048  }
 0x17d   :  { %342 = vsyncadd [#allocation5], 4294965248 }
 0x17e   :  { %280 = vsyncpa [#allocation5], 1 }

</bundles_post_ra>
